<compile_context>
chip_gen: v7x
topology: tpu7x:2x2x1
jax: 0.10.0
libtpu: 0.0.40
codegen_flags: <defaults>
</compile_context>

<pallas_src>
import jax
import jax.numpy as jnp
from jax.experimental import pallas as pl
from jax.experimental.pallas import tpu as pltpu


def _round_up(n: int, m: int) -> int:
    return ((n + m - 1) // m) * m


def _device_kind() -> str:
    try:
        return jax.devices()[0].device_kind.lower()
    except Exception:
        return ""


def _pick_tile_b(batch: int, tile_b_max: int, want_two_steps: bool) -> int:
    tb = min(tile_b_max, _round_up(batch, 8))
    if tb >= 512:
        tb = (tb // 256) * 256          # multiple of 256 fills the 256-wide MXU M dim
    if want_two_steps:                  # v7x: >= 2 grid steps so both TCs get work
        while tb > 8 and pl.cdiv(batch, tb) < 2:
            tb = max(8, _round_up(tb // 2, 8))
    return tb


# ----------------------------- Pallas kernel --------------------------------
def _make_moe_kernel(num_experts: int, k: int, d_out_pad: int, batch_size: int):
    E = num_experts

    def moe_kernel(x_ref, wg_ref, wflat_ref, b_ref, y_ref, stats_ref):
        x_f32 = x_ref[...]                                    # (TB, Din) f32
        tb = x_ref.shape[0]
        e_pad = wg_ref.shape[1]                               # lane-padded gate width

        # ---- gating: logits = x @ w_gate_padded  (tiny f32 MXU matmul) ----
        logits = jnp.dot(x_f32, wg_ref[...],
                         preferred_element_type=jnp.float32)  # (TB, Epad)
        col = jax.lax.broadcasted_iota(jnp.int32, (tb, e_pad), 1)
        neg_inf = jnp.float32(-jnp.inf)
        logits = jnp.where(col < E, logits, neg_inf)          # mask padded experts

        # ---- k-th largest per row via k iterative maxes (k, E static & tiny) ----
        cur = logits
        kth = jnp.max(cur, axis=1, keepdims=True)
        for _ in range(k - 1):
            cur = jnp.where(cur >= kth, neg_inf, cur)
            kth = jnp.max(cur, axis=1, keepdims=True)

        # ---- masked softmax over the top-k entries, scattered in place ----
        # TODO(synk): exact ties at the k-th logit select >k entries (torch.topk
        #             picks exactly k); measure-zero for continuous inputs.
        mask = logits >= kth
        rowmax = jnp.max(logits, axis=1, keepdims=True)
        exps = jnp.where(mask, jnp.exp(logits - rowmax), 0.0)
        gates = exps / jnp.sum(exps, axis=1, keepdims=True)   # (TB, Epad) f32

        # ---- per-tile importance / load stats (masked to valid batch rows) ----
        row = (jax.lax.broadcasted_iota(jnp.int32, (tb, 1), 0)
               + pl.program_id(0) * tb)
        valid = (row < batch_size).astype(jnp.float32)        # (TB, 1)
        gv = gates * valid
        imp = jnp.sum(gv, axis=0, keepdims=True)              # (1, Epad)
        load = jnp.sum(jnp.where(gv > 0, 1.0, 0.0),
                       axis=0, keepdims=True)                 # (1, Epad)
        sub = jax.lax.broadcasted_iota(jnp.int32, (8, e_pad), 0)
        stats_ref[...] = jnp.where(sub == 0, imp,
                                   jnp.where(sub == 1, load, 0.0))

        # ---- expert matmuls, one lane-aligned chunk per expert, gate-scale in
        #      the epilogue (no full (TB, E*Dout) intermediate materialized) ----
        x_bf = x_f32.astype(jnp.bfloat16)
        acc = jnp.zeros(y_ref.shape, jnp.float32)             # (TB, Dout_pad)
        for e in range(E):
            lo, hi = e * d_out_pad, (e + 1) * d_out_pad
            h_e = jnp.dot(x_bf, wflat_ref[:, lo:hi],
                          preferred_element_type=jnp.float32)
            h_e = h_e + b_ref[:, lo:hi]
            acc = acc + gates[:, e:e + 1] * h_e
        y_ref[...] = acc.astype(y_ref.dtype)

    return moe_kernel


# ----------------------- one-time parameter preprocessing --------------------
def prepare_sparse_moe_params(w_gate, expert_w, expert_b):
    """Hoisted out of the forward pass: pad / transpose / cast weights once."""
    d_in, E = w_gate.shape
    E2, d_in2, d_out = expert_w.shape
    assert E2 == E and d_in2 == d_in

    e_pad = _round_up(max(E, 128), 128)            # lane-dense gating width
    dp = _round_up(max(d_out, 128), 128)           # per-expert lane-aligned block

    wg_p = jnp.zeros((d_in, e_pad), jnp.float32).at[:, :E].set(
        w_gate.astype(jnp.float32))

    w_pad = jnp.zeros((E, d_in, dp), jnp.bfloat16).at[:, :, :d_out].set(
        expert_w.astype(jnp.bfloat16))
    w_flat = jnp.transpose(w_pad, (1, 0, 2)).reshape(d_in, E * dp)  # (Din, E*dp) bf16

    b_flat = jnp.zeros((E, dp), jnp.float32).at[:, :d_out].set(
        expert_b.astype(jnp.float32)).reshape(1, E * dp)

    return dict(wg=wg_p, w=w_flat, b=b_flat,
                E=E, d_in=d_in, d_out=d_out, d_out_pad=dp, e_pad=e_pad)


# ----------------------------- wrapper ---------------------------------------
def sparse_moe_forward(x, params, *, k: int, loss_coef: float = 0.01,
                       tile_b_max: int = 512):
    """Pallas-backed SparseMOE.forward (eval mode). Returns (y, loss)."""
    B, d_in = x.shape
    E = params["E"]
    dp = params["d_out_pad"]
    e_pad = params["e_pad"]
    d_out = params["d_out"]
    assert d_in == params["d_in"] and 1 <= k <= E

    kind = _device_kind()
    is_v7 = "v7" in kind
    # v5e/v6e have 128 MiB physical VMEM -> generous limit; v7x only 64 MiB.
    vmem_limit = (48 if is_v7 else 96) * 1024 * 1024

    tile_b = _pick_tile_b(B, tile_b_max, want_two_steps=is_v7)
    b_pad = _round_up(B, tile_b)
    num_tiles = b_pad // tile_b

    x_p = x.astype(jnp.float32)
    if b_pad != B:
        x_p = jnp.pad(x_p, ((0, b_pad - B), (0, 0)))

    kernel = _make_moe_kernel(E, k, dp, B)

    y_pad, stats = pl.pallas_call(
        kernel,
        out_shape=(jax.ShapeDtypeStruct((b_pad, dp), jnp.float32),
                   jax.ShapeDtypeStruct((num_tiles * 8, e_pad), jnp.float32)),
        grid_spec=pltpu.PrefetchScalarGridSpec(
            num_scalar_prefetch=0,
            grid=(num_tiles,),
            in_specs=[
                # x batch tile (pipelined)
                pl.BlockSpec((tile_b, d_in), lambda i: (i, 0)),
                # resident constants: single-buffered (block index never changes)
                pl.BlockSpec((d_in, e_pad), lambda i: (0, 0),
                             pipeline_mode=pl.Buffered(1)),
                pl.BlockSpec((d_in, E * dp), lambda i: (0, 0),
                             pipeline_mode=pl.Buffered(1)),
                pl.BlockSpec((1, E * dp), lambda i: (0, 0),
                             pipeline_mode=pl.Buffered(1)),
            ],
            out_specs=(
                pl.BlockSpec((tile_b, dp), lambda i: (i, 0)),   # lane-dense y tile
                pl.BlockSpec((8, e_pad), lambda i: (i, 0)),     # per-tile stats
            ),
        ),
        compiler_params=pltpu.CompilerParams(
            dimension_semantics=("parallel",),
            vmem_limit_bytes=vmem_limit,
        ),
    )(x_p, params["wg"], params["w"], params["b"])

    y = y_pad[:B, :d_out]

    stats = stats.reshape(num_tiles, 8, e_pad)
    importance = stats[:, 0, :E].sum(axis=0)                  # (E,)
    load = stats[:, 1, :E].sum(axis=0)                        # (E,) eval path

    def cv_squared(v):
        if E <= 1:                        # matches torch guard (avoids ddof NaN)
            return jnp.float32(0.0)
        eps = 1e-10
        v = v.astype(jnp.float32)
        return jnp.var(v, ddof=1) / (jnp.mean(v) ** 2 + eps)

    loss = (cv_squared(importance) + cv_squared(load)) * loss_coef
    return y, loss


# ----------------------------- pure-JAX reference ----------------------------
def sparse_moe_reference(x, w_gate, expert_w, expert_b, *, k: int,
                         loss_coef: float = 0.01, matmul_dtype=jnp.float32):
    x = x.astype(jnp.float32)
    E = expert_w.shape[0]
    logits = jnp.dot(x, w_gate.astype(jnp.float32),
                     precision=jax.lax.Precision.HIGHEST)            # (B, E)
    top_vals, top_idx = jax.lax.top_k(logits, k)
    top_gates = jax.nn.softmax(top_vals, axis=1)
    gates = jnp.zeros_like(logits).at[
        jnp.arange(x.shape[0])[:, None], top_idx].set(top_gates)

    xm = x.astype(matmul_dtype)
    outs = jnp.stack([
        jnp.dot(xm, expert_w[e].astype(matmul_dtype),
                preferred_element_type=jnp.float32)
        + expert_b[e].astype(jnp.float32)
        for e in range(E)], axis=2)                                  # (B, Dout, E)
    y = jnp.sum(outs * gates[:, None, :], axis=2)

    def cv_squared(v):
        if E <= 1:
            return jnp.float32(0.0)
        eps = 1e-10
        return jnp.var(v.astype(jnp.float32), ddof=1) / (jnp.mean(v) ** 2 + eps)

    importance = gates.sum(0)
    load = (gates > 0).sum(0).astype(jnp.float32)
    loss = (cv_squared(importance) + cv_squared(load)) * loss_coef
    return y, loss, gates


# ----------------------------------- main ------------------------------------
if __name__ == "__main__":
    B, D_IN, D_OUT, E, K = 8, 32, 32, 4, 2

    key = jax.random.PRNGKey(0)
    kx, kg, kw, kb = jax.random.split(key, 4)
    x = jax.random.normal(kx, (B, D_IN), dtype=jnp.float32)
    w_gate = jax.random.normal(kg, (D_IN, E), dtype=jnp.float32) * 0.1
    expert_w = jax.random.normal(kw, (E, D_IN, D_OUT), dtype=jnp.float32) * 0.1
    expert_b = jax.random.normal(kb, (E, D_OUT), dtype=jnp.float32) * 0.1

    params = prepare_sparse_moe_params(w_gate, expert_w, expert_b)
    y, loss = sparse_moe_forward(x, params, k=K, loss_coef=0.01)
    jax.block_until_ready((y, loss))

    # MXU-precision-matched reference (bf16 expert-matmul inputs, f32 accumulate)
    y_bf, loss_bf, _ = sparse_moe_reference(
        x, w_gate, expert_w, expert_b, k=K, loss_coef=0.01,
        matmul_dtype=jnp.bfloat16)
    # full-f32 reference (semantic check; loose tolerance for bf16 MXU inputs)
    y_f32, loss_f32, _ = sparse_moe_reference(
        x, w_gate, expert_w, expert_b, k=K, loss_coef=0.01,
        matmul_dtype=jnp.float32)

    assert y.shape == (B, D_OUT), "y shape mismatch"
    assert jnp.allclose(y, y_bf, atol=2e-3, rtol=2e-3), "y mismatch vs bf16 reference"
    assert jnp.allclose(y, y_f32, atol=5e-2, rtol=5e-2), "y mismatch vs f32 reference"
    assert jnp.allclose(loss, loss_bf, atol=1e-4, rtol=1e-3), "loss mismatch"
    assert jnp.allclose(loss, loss_f32, atol=1e-4, rtol=1e-3), "loss mismatch (f32)"

    print("KERNEL_OK")
</pallas_src>

<mosaic_0001>
module attributes {stable_mosaic.version = 11 : i64} {
  func.func @moe_kernel(%arg0: i32, %arg1: memref<8x32xf32, #tpu.memory_space<vmem>>, %arg2: memref<32x128xf32, #tpu.memory_space<vmem>>, %arg3: memref<32x512xbf16, #tpu.memory_space<vmem>>, %arg4: memref<1x512xf32, #tpu.memory_space<vmem>>, %arg5: memref<8x128xf32, #tpu.memory_space<vmem>>, %arg6: memref<8x128xf32, #tpu.memory_space<vmem>>) attributes {dimension_semantics = [#tpu.dimension_semantics<parallel>], iteration_bounds = array<i64: 1>, scalar_prefetch = 0 : i64, scratch_operands = 0 : i64, tpu.core_type = #tpu.core_type<tc>, window_params = [{transform_indices = @transform_0, window_bounds = array<i64: 8, 32>}, {pipeline_mode = #tpu.pipeline_mode<synchronous>, transform_indices = @transform_1, window_bounds = array<i64: 32, 128>}, {pipeline_mode = #tpu.pipeline_mode<synchronous>, transform_indices = @transform_2, window_bounds = array<i64: 32, 512>}, {pipeline_mode = #tpu.pipeline_mode<synchronous>, transform_indices = @transform_3, window_bounds = array<i64: 1, 512>}, {transform_indices = @transform_4, window_bounds = array<i64: 8, 128>}, {transform_indices = @transform_5, window_bounds = array<i64: 8, 128>}]} {
    %c0 = arith.constant 0 : index
    %c0_0 = arith.constant 0 : index
    %0 = vector.load %arg1[%c0, %c0_0] : memref<8x32xf32, #tpu.memory_space<vmem>>, vector<8x32xf32>
    %c0_1 = arith.constant 0 : index
    %c0_2 = arith.constant 0 : index
    %1 = vector.load %arg2[%c0_1, %c0_2] : memref<32x128xf32, #tpu.memory_space<vmem>>, vector<32x128xf32>
    %cst = arith.constant dense<0.000000e+00> : vector<8x128xf32>
    %2 = tpu.matmul %0, %1, %cst {dimension_numbers = #tpu.dot_dimension_numbers<[1], [0], [0], [1], [0, 0, 1, 1], [], []>} : vector<8x32xf32>, vector<32x128xf32>, vector<8x128xf32> -> vector<8x128xf32>
    %3 = tpu.iota {dimensions = array<i32: 1>} : vector<8x128xi32>
    %c4_i32 = arith.constant 4 : i32
    %4 = vector.broadcast %c4_i32 : i32 to vector<8x128xi32>
    %5 = arith.cmpi slt, %3, %4 : vector<8x128xi32>
    %cst_3 = arith.constant 0xFF800000 : f32
    %6 = vector.broadcast %cst_3 : f32 to vector<8x128xf32>
    %7 = arith.select %5, %2, %6 : vector<8x128xi1>, vector<8x128xf32>
    %cst_4 = arith.constant dense<0xFF800000> : vector<8xf32>
    %8 = vector.multi_reduction <maximumf>, %7, %cst_4 [1] : vector<8x128xf32> to vector<8xf32>
    %9 = vector.shape_cast %8 : vector<8xf32> to vector<8x1xf32>
    %10 = vector.broadcast %9 : vector<8x1xf32> to vector<8x128xf32>
    %11 = arith.cmpf oge, %7, %10 : vector<8x128xf32>
    %cst_5 = arith.constant 0xFF800000 : f32
    %12 = vector.broadcast %cst_5 : f32 to vector<8x128xf32>
    %13 = arith.select %11, %12, %7 : vector<8x128xi1>, vector<8x128xf32>
    %cst_6 = arith.constant dense<0xFF800000> : vector<8xf32>
    %14 = vector.multi_reduction <maximumf>, %13, %cst_6 [1] : vector<8x128xf32> to vector<8xf32>
    %15 = vector.shape_cast %14 : vector<8xf32> to vector<8x1xf32>
    %16 = vector.broadcast %15 : vector<8x1xf32> to vector<8x128xf32>
    %17 = arith.cmpf oge, %7, %16 : vector<8x128xf32>
    %cst_7 = arith.constant dense<0xFF800000> : vector<8xf32>
    %18 = vector.multi_reduction <maximumf>, %7, %cst_7 [1] : vector<8x128xf32> to vector<8xf32>
    %19 = vector.shape_cast %18 : vector<8xf32> to vector<8x1xf32>
    %20 = vector.broadcast %19 : vector<8x1xf32> to vector<8x128xf32>
    %21 = arith.subf %7, %20 : vector<8x128xf32>
    %22 = math.exp %21 : vector<8x128xf32>
    %cst_8 = arith.constant 0.000000e+00 : f32
    %23 = vector.broadcast %cst_8 : f32 to vector<8x128xf32>
    %24 = arith.select %17, %22, %23 : vector<8x128xi1>, vector<8x128xf32>
    %cst_9 = arith.constant dense<0.000000e+00> : vector<8xf32>
    %25 = vector.multi_reduction <add>, %24, %cst_9 [1] : vector<8x128xf32> to vector<8xf32>
    %26 = vector.shape_cast %25 : vector<8xf32> to vector<8x1xf32>
    %27 = vector.broadcast %26 : vector<8x1xf32> to vector<8x128xf32>
    %28 = arith.divf %24, %27 : vector<8x128xf32>
    %29 = tpu.iota {dimensions = array<i32: 0>} : vector<8x1xi32>
    %c8_i32 = arith.constant 8 : i32
    %30 = arith.muli %arg0, %c8_i32 : i32
    %31 = vector.broadcast %30 : i32 to vector<8x1xi32>
    %32 = arith.addi %29, %31 : vector<8x1xi32>
    %c8_i32_10 = arith.constant 8 : i32
    %33 = vector.broadcast %c8_i32_10 : i32 to vector<8x1xi32>
    %34 = arith.cmpi slt, %32, %33 : vector<8x1xi32>
    %35 = arith.extui %34 : vector<8x1xi1> to vector<8x1xi32>
    %36 = arith.sitofp %35 : vector<8x1xi32> to vector<8x1xf32>
    %37 = vector.broadcast %36 : vector<8x1xf32> to vector<8x128xf32>
    %38 = arith.mulf %28, %37 : vector<8x128xf32>
    %cst_11 = arith.constant dense<0.000000e+00> : vector<128xf32>
    %39 = vector.multi_reduction <add>, %38, %cst_11 [0] : vector<8x128xf32> to vector<128xf32>
    %40 = vector.shape_cast %39 : vector<128xf32> to vector<1x128xf32>
    %cst_12 = arith.constant 0.000000e+00 : f32
    %41 = vector.broadcast %cst_12 : f32 to vector<8x128xf32>
    %42 = arith.cmpf ogt, %38, %41 : vector<8x128xf32>
    %cst_13 = arith.constant 1.000000e+00 : f32
    %cst_14 = arith.constant 0.000000e+00 : f32
    %43 = vector.broadcast %cst_13 : f32 to vector<8x128xf32>
    %44 = vector.broadcast %cst_14 : f32 to vector<8x128xf32>
    %45 = arith.select %42, %43, %44 : vector<8x128xi1>, vector<8x128xf32>
    %cst_15 = arith.constant dense<0.000000e+00> : vector<128xf32>
    %46 = vector.multi_reduction <add>, %45, %cst_15 [0] : vector<8x128xf32> to vector<128xf32>
    %47 = vector.shape_cast %46 : vector<128xf32> to vector<1x128xf32>
    %48 = tpu.iota {dimensions = array<i32: 0>} : vector<8x128xi32>
    %c0_i32 = arith.constant 0 : i32
    %49 = vector.broadcast %c0_i32 : i32 to vector<8x128xi32>
    %50 = arith.cmpi eq, %48, %49 : vector<8x128xi32>
    %c1_i32 = arith.constant 1 : i32
    %51 = vector.broadcast %c1_i32 : i32 to vector<8x128xi32>
    %52 = arith.cmpi eq, %48, %51 : vector<8x128xi32>
    %cst_16 = arith.constant 0.000000e+00 : f32
    %53 = vector.shape_cast %47 : vector<1x128xf32> to vector<1x128xf32>
    %54 = vector.broadcast %53 : vector<1x128xf32> to vector<8x128xf32>
    %55 = vector.broadcast %cst_16 : f32 to vector<8x128xf32>
    %56 = arith.select %52, %54, %55 : vector<8x128xi1>, vector<8x128xf32>
    %57 = vector.shape_cast %40 : vector<1x128xf32> to vector<1x128xf32>
    %58 = vector.broadcast %57 : vector<1x128xf32> to vector<8x128xf32>
    %59 = arith.select %50, %58, %56 : vector<8x128xi1>, vector<8x128xf32>
    %c0_17 = arith.constant 0 : index
    %c0_18 = arith.constant 0 : index
    %60 = vector.load %arg6[%c0_17, %c0_18] : memref<8x128xf32, #tpu.memory_space<vmem>>, vector<8x128xf32>
    tpu.vector_store %arg6[%c0_17, %c0_18], %59 {strides = array<i32>} : memref<8x128xf32, #tpu.memory_space<vmem>>, vector<8x128xf32>,
    %61 = arith.truncf %0 : vector<8x32xf32> to vector<8x32xbf16>
    %cst_19 = arith.constant 0.000000e+00 : f32
    %62 = vector.broadcast %cst_19 : f32 to vector<8x128xf32>
    %c0_20 = arith.constant 0 : index
    %c0_21 = arith.constant 0 : index
    %63 = vector.load %arg3[%c0_20, %c0_21] : memref<32x512xbf16, #tpu.memory_space<vmem>>, vector<32x128xbf16>
    %cst_22 = arith.constant dense<0.000000e+00> : vector<8x128xf32>
    %64 = tpu.matmul %61, %63, %cst_22 {dimension_numbers = #tpu.dot_dimension_numbers<[1], [0], [0], [1], [0, 0, 1, 1], [], []>} : vector<8x32xbf16>, vector<32x128xbf16>, vector<8x128xf32> -> vector<8x128xf32>
    %c0_23 = arith.constant 0 : index
    %c0_24 = arith.constant 0 : index
    %65 = vector.load %arg4[%c0_23, %c0_24] : memref<1x512xf32, #tpu.memory_space<vmem>>, vector<1x128xf32>
    %66 = vector.broadcast %65 : vector<1x128xf32> to vector<8x128xf32>
    %67 = arith.addf %64, %66 : vector<8x128xf32>
    %68 = vector.extract_strided_slice %28 {offsets = [0, 0], sizes = [8, 1], strides = [1, 1]} : vector<8x128xf32> to vector<8x1xf32>
    %69 = vector.broadcast %68 : vector<8x1xf32> to vector<8x128xf32>
    %70 = arith.mulf %69, %67 : vector<8x128xf32>
    %71 = arith.addf %62, %70 : vector<8x128xf32>
    %c0_25 = arith.constant 0 : index
    %c128 = arith.constant 128 : index
    %72 = vector.load %arg3[%c0_25, %c128] : memref<32x512xbf16, #tpu.memory_space<vmem>>, vector<32x128xbf16>
    %cst_26 = arith.constant dense<0.000000e+00> : vector<8x128xf32>
    %73 = tpu.matmul %61, %72, %cst_26 {dimension_numbers = #tpu.dot_dimension_numbers<[1], [0], [0], [1], [0, 0, 1, 1], [], []>} : vector<8x32xbf16>, vector<32x128xbf16>, vector<8x128xf32> -> vector<8x128xf32>
    %c0_27 = arith.constant 0 : index
    %c128_28 = arith.constant 128 : index
    %74 = vector.load %arg4[%c0_27, %c128_28] : memref<1x512xf32, #tpu.memory_space<vmem>>, vector<1x128xf32>
    %75 = vector.broadcast %74 : vector<1x128xf32> to vector<8x128xf32>
    %76 = arith.addf %73, %75 : vector<8x128xf32>
    %77 = vector.extract_strided_slice %28 {offsets = [0, 1], sizes = [8, 1], strides = [1, 1]} : vector<8x128xf32> to vector<8x1xf32>
    %78 = vector.broadcast %77 : vector<8x1xf32> to vector<8x128xf32>
    %79 = arith.mulf %78, %76 : vector<8x128xf32>
    %80 = arith.addf %71, %79 : vector<8x128xf32>
    %c0_29 = arith.constant 0 : index
    %c256 = arith.constant 256 : index
    %81 = vector.load %arg3[%c0_29, %c256] : memref<32x512xbf16, #tpu.memory_space<vmem>>, vector<32x128xbf16>
    %cst_30 = arith.constant dense<0.000000e+00> : vector<8x128xf32>
    %82 = tpu.matmul %61, %81, %cst_30 {dimension_numbers = #tpu.dot_dimension_numbers<[1], [0], [0], [1], [0, 0, 1, 1], [], []>} : vector<8x32xbf16>, vector<32x128xbf16>, vector<8x128xf32> -> vector<8x128xf32>
    %c0_31 = arith.constant 0 : index
    %c256_32 = arith.constant 256 : index
    %83 = vector.load %arg4[%c0_31, %c256_32] : memref<1x512xf32, #tpu.memory_space<vmem>>, vector<1x128xf32>
    %84 = vector.broadcast %83 : vector<1x128xf32> to vector<8x128xf32>
    %85 = arith.addf %82, %84 : vector<8x128xf32>
    %86 = vector.extract_strided_slice %28 {offsets = [0, 2], sizes = [8, 1], strides = [1, 1]} : vector<8x128xf32> to vector<8x1xf32>
    %87 = vector.broadcast %86 : vector<8x1xf32> to vector<8x128xf32>
    %88 = arith.mulf %87, %85 : vector<8x128xf32>
    %89 = arith.addf %80, %88 : vector<8x128xf32>
    %c0_33 = arith.constant 0 : index
    %c384 = arith.constant 384 : index
    %90 = vector.load %arg3[%c0_33, %c384] : memref<32x512xbf16, #tpu.memory_space<vmem>>, vector<32x128xbf16>
    %cst_34 = arith.constant dense<0.000000e+00> : vector<8x128xf32>
    %91 = tpu.matmul %61, %90, %cst_34 {dimension_numbers = #tpu.dot_dimension_numbers<[1], [0], [0], [1], [0, 0, 1, 1], [], []>} : vector<8x32xbf16>, vector<32x128xbf16>, vector<8x128xf32> -> vector<8x128xf32>
    %c0_35 = arith.constant 0 : index
    %c384_36 = arith.constant 384 : index
    %92 = vector.load %arg4[%c0_35, %c384_36] : memref<1x512xf32, #tpu.memory_space<vmem>>, vector<1x128xf32>
    %93 = vector.broadcast %92 : vector<1x128xf32> to vector<8x128xf32>
    %94 = arith.addf %91, %93 : vector<8x128xf32>
    %95 = vector.extract_strided_slice %28 {offsets = [0, 3], sizes = [8, 1], strides = [1, 1]} : vector<8x128xf32> to vector<8x1xf32>
    %96 = vector.broadcast %95 : vector<8x1xf32> to vector<8x128xf32>
    %97 = arith.mulf %96, %94 : vector<8x128xf32>
    %98 = arith.addf %89, %97 : vector<8x128xf32>
    %c0_37 = arith.constant 0 : index
    %c0_38 = arith.constant 0 : index
    %99 = vector.load %arg5[%c0_37, %c0_38] : memref<8x128xf32, #tpu.memory_space<vmem>>, vector<8x128xf32>
    tpu.vector_store %arg5[%c0_37, %c0_38], %98 {strides = array<i32>} : memref<8x128xf32, #tpu.memory_space<vmem>>, vector<8x128xf32>,
    return
  }
  func.func @transform_0(%arg0: i32) -> (i32, i32) {
    %c0_i32 = arith.constant 0 : i32
    %c0_i32_0 = arith.constant 0 : i32
    return %arg0, %c0_i32 : i32, i32
  }
  func.func @transform_1(%arg0: i32) -> (i32, i32) {
    %c0_i32 = arith.constant 0 : i32
    %c0_i32_0 = arith.constant 0 : i32
    %c0_i32_1 = arith.constant 0 : i32
    return %c0_i32, %c0_i32_0 : i32, i32
  }
  func.func @transform_2(%arg0: i32) -> (i32, i32) {
    %c0_i32 = arith.constant 0 : i32
    %c0_i32_0 = arith.constant 0 : i32
    %c0_i32_1 = arith.constant 0 : i32
    return %c0_i32, %c0_i32_0 : i32, i32
  }
  func.func @transform_3(%arg0: i32) -> (i32, i32) {
    %c0_i32 = arith.constant 0 : i32
    %c0_i32_0 = arith.constant 0 : i32
    %c0_i32_1 = arith.constant 0 : i32
    return %c0_i32, %c0_i32_0 : i32, i32
  }
  func.func @transform_4(%arg0: i32) -> (i32, i32) {
    %c0_i32 = arith.constant 0 : i32
    %c0_i32_0 = arith.constant 0 : i32
    return %arg0, %c0_i32 : i32, i32
  }
  func.func @transform_5(%arg0: i32) -> (i32, i32) {
    %c0_i32 = arith.constant 0 : i32
    %c0_i32_0 = arith.constant 0 : i32
    return %arg0, %c0_i32 : i32, i32
  }
}

</mosaic_0001>

<bundles_post_ra>
// kernel: tpu_custom_call.1
= control target key start
LH: loop header
LB: loop body
LE: loop exit
PB: predicated region body
PF: predicated region fallthrough
CT: control target
= control target key end

     0   :  { %11 = vsyncpa [#allocation3], 0  ;;  %s922_s0 = inlined_call_operand.hbm [shape: f32[8,32], index: 0, kind: input, shape index: {}]   ;;  %s923_s1 = inlined_call_operand.hbm [shape: f32[32,128], index: 1, kind: input, shape index: {}]   ;;  %s924_s2 = inlined_call_operand.hbm [shape: bf16[32,512], index: 2, kind: input, shape index: {}]   ;;  %s925_s3 = inlined_call_operand.hbm [shape: f32[1,512], index: 3, kind: input, shape index: {}]   ;;  %s926_s4 = inlined_call_operand.hbm [shape: f32[8,128], index: 4, kind: output, shape index: {0}]   ;;  %s927_s5 = inlined_call_operand.hbm [shape: f32[8,128], index: 5, kind: output, shape index: {1}]  }
   0x1   :  { %12 = vsyncpa [#allocation6], 0 }
   0x2   :  { %13 = vsyncpa [#allocation9], 0 }
   0x3   :  { %14 = vsyncpa [#allocation4], 0 }
   0x4   :  { %15 = vsyncpa [#allocation12], 0  ;;  %s771_s18 = smov [#allocation5]   ;;  %s629_s22 = scalar_lea.hbm %s923_s1, 512 }
   0x5   :  { %s31_s19 = sshll.u32 %s771_s18, 4  ;;  %p630_p0 = scmp.ne.s32.totalorder %s923_s1, %s629_s22  ;;  %s32_s19 = int_to_ptr.vmem [resolvable:$true] %s31_s19 }
   0x6   :  { %p633_p1 = scmp.lt.u32.totalorder %s629_s22, %s923_s1 }
   0x8   :  { %p635_p2 = pnand %p633_p1, %p630_p0 }
   0xa   :  { %638 = shalt.err (!%p635_p2)
}
   0xb   :  { %s639_s27 = scalar_lea.vmem %s32_s19, 512  ;;  %p644_p4 = scmp.lt.s32.totalorder %s32_s19, %s32_s19 }
   0xc   :  { %p640_p3 = scmp.ne.s32.totalorder %s32_s19, %s639_s27  ;;  %p645_p5 = scmp.lt.s32.totalorder %s639_s27, %s639_s27 }
   0xe   :  { %p646_p6 = por %p645_p5, %p644_p4 }
  0x10   :  { %p647_p7 = pnand %p646_p6, %p640_p3 }
  0x12   :  { %650 = shalt.err (!%p647_p7)
}
  0x13   :  { %s772_s28 = smov 128   ;;  %s773_s29 = smov 8  }
  0x14   :  { %37 = dma.hbm_to_vmem [thread:$0]  %s923_s1, 512, %s32_s19, [#allocation6], %s772_s28, %s772_s28, %s773_s29  }
  0x15   :  { %s774_s7 = smov [#allocation2]   ;;  %s775_s9 = smov [#allocation7]  }
  0x16   :  { %s22_s8 = sshll.u32 %s774_s7, 4  ;;  %s43_s10 = sshll.u32 %s775_s9, 4  ;;  %s23_s8 = int_to_ptr.vmem [resolvable:$true] %s22_s8  ;;  %s44_s10 = int_to_ptr.vmem [resolvable:$true] %s43_s10 }
  0x17   :  { %s651_s13 = scalar_lea.hbm %s922_s0, 128 }
  0x18   :  { %p652_p8 = scmp.ne.s32.totalorder %s922_s0, %s651_s13  ;;  %p655_p9 = scmp.lt.u32.totalorder %s651_s13, %s922_s0 }
  0x1a   :  { %p657_p10 = pnand %p655_p9, %p652_p8 }
  0x1c   :  { %660 = shalt.err (!%p657_p10)
}
  0x1d   :  { %s661_s1 = scalar_lea.vmem %s23_s8, 128  ;;  %p666_p12 = scmp.lt.s32.totalorder %s23_s8, %s23_s8 }
  0x1e   :  { %p662_p11 = scmp.ne.s32.totalorder %s23_s8, %s661_s1  ;;  %p667_p13 = scmp.lt.s32.totalorder %s661_s1, %s661_s1 }
  0x20   :  { %p668_p0 = por %p667_p13, %p666_p12 }
  0x22   :  { %p669_p1 = pnand %p668_p0, %p662_p11 }
  0x24   :  { %672 = shalt.err (!%p669_p1)
}
  0x25   :  { %25 = dma.hbm_to_vmem [thread:$0]  %s922_s0, 128, %s23_s8, [#allocation3]  }
  0x26   :  { %s673_s22 = scalar_lea.hbm %s924_s2, 1024 }
  0x27   :  { %p674_p2 = scmp.ne.s32.totalorder %s924_s2, %s673_s22  ;;  %p677_p3 = scmp.lt.u32.totalorder %s673_s22, %s924_s2 }
  0x29   :  { %p679_p4 = pnand %p677_p3, %p674_p2 }
  0x2b   :  { %682 = shalt.err (!%p679_p4)
}
  0x2c   :  { %s683_s27 = scalar_lea.vmem %s44_s10, 1024  ;;  %p688_p6 = scmp.lt.s32.totalorder %s44_s10, %s44_s10 }
  0x2d   :  { %p684_p5 = scmp.ne.s32.totalorder %s44_s10, %s683_s27  ;;  %p689_p7 = scmp.lt.s32.totalorder %s683_s27, %s683_s27 }
  0x2f   :  { %p690_p8 = por %p689_p7, %p688_p6 }
  0x31   :  { %p691_p9 = pnand %p690_p8, %p684_p5 }
  0x33   :  { %694 = shalt.err (!%p691_p9)
}
  0x34   :  { %s776_s0 = smov 256   ;;  %s777_s28 = smov 16  }
  0x35   :  { %49 = dma.hbm_to_vmem [thread:$0]  %s924_s2, 1024, %s44_s10, [#allocation6], %s776_s0, %s776_s0, %s777_s28  }
  0x36   :  { %s778_s6 = smov [#allocation8]   ;;  %s695_s11 = scalar_lea.hbm %s925_s3, 64 }
  0x37   :  { %s56_s7 = sshll.u32 %s778_s6, 4  ;;  %p696_p10 = scmp.ne.s32.totalorder %s925_s3, %s695_s11  ;;  %s57_s7 = int_to_ptr.vmem [resolvable:$true] %s56_s7 }
  0x38   :  { %p699_p11 = scmp.lt.u32.totalorder %s695_s11, %s925_s3 }
  0x3a   :  { %p701_p12 = pnand %p699_p11, %p696_p10 }
  0x3c   :  { %704 = shalt.err (!%p701_p12)
}
  0x3d   :  { %s705_s16 = scalar_lea.vmem %s57_s7, 64  ;;  %p710_p0 = scmp.lt.s32.totalorder %s57_s7, %s57_s7 }
  0x3e   :  { %p706_p13 = scmp.ne.s32.totalorder %s57_s7, %s705_s16  ;;  %p711_p1 = scmp.lt.s32.totalorder %s705_s16, %s705_s16 }
  0x40   :  { %p712_p2 = por %p711_p1, %p710_p0 }
  0x42   :  { %p713_p3 = pnand %p712_p2, %p706_p13 }
  0x44   :  { %716 = shalt.err (!%p713_p3)
}
  0x45   :  { %59 = dma.hbm_to_vmem [thread:$0]  %s925_s3, 64, %s57_s7, [#allocation9]  }
  0x46   :  { %761 = dma.done.wait [#allocation3], 128  }
  0x47   :  { %762 = vsyncadd [#allocation3], 4294967168 }
  0x48   :  { %763 = dma.done.wait [#allocation6], 1536  }
  0x49   :  { %764 = vsyncadd [#allocation6], 4294965760 }
  0x4a   :  { %765 = dma.done.wait [#allocation9], 64  }
  0x4b   :  { %766 = vsyncadd [#allocation9], 4294967232  ;;  %v779_v0 = vmov 0.0|0.0   ;;  %vm780_vm0 = vmmov 0   ;;  %v781_v1 = vmov 0.0   ;;  %v74_v2 = vld [vmem:[#allocation5] sm:$0xff]  ;;  %v152_v9 = vlaneseq }
  0x4c   :  { %589 = vmatprep.subr.bf16.mxu0 %v779_v0  ;;  %554 = vmatprep.mubr.msk.f32.mxu0 %vm780_vm0, %v781_v1  ;;  %v75_v3 = vld [vmem:[#allocation5 + $0x8] sm:$0xff]  ;;  %v76_v4 = vld [vmem:[#allocation5 + $0x10] sm:$0xff]  ;;  %v77_v6 = vld [vmem:[#allocation5 + $0x18] sm:$0xff]  ;;  %vm78_vm1 = vcmask 261120   ;;  %v782_v30 = vmov 1   ;;  %v783_v31 = vmov 0  }
  0x4d   :  { %557 = vmatprep.subr.bf16.mxu1 %v781_v1  ;;  %561 = vmatprep.mubr.msk.bf16.mxu1 %vm780_vm0, %v781_v1  ;;  %v590_v5 = vpack.c.bf16 %v75_v3, %v74_v2  ;;  %v593_v7 = vpack.c.bf16 %v77_v6, %v76_v4  ;;  %v73_v8 = vld [vmem:[#allocation2] sm:$0xff]  ;;  %v153_v10 = vand.u32 127, %v152_v9  ;;  %v617_v16 = vld [vmem:[#allocation7] ss:$16 sps:$4 sm:$0xff]   ;;  %v618_v17 = vld [vmem:[#allocation7 + $0x4] ss:$16 sps:$4 sm:$0xff]  }
  0x4e   :  { %558 = vmatpush3.bf16.msra.mxu1 %v617_v16  ;;  %v619_v18 = vld [vmem:[#allocation7 + $0x20] ss:$16 sps:$4 sm:$0xff]   ;;  %v620_v19 = vld [vmem:[#allocation7 + $0x24] ss:$16 sps:$4 sm:$0xff]   ;;  %v199_v20 = vpack.c.bf16 %v73_v8, %v73_v8  ;;  %v621_v21 = vld [vmem:[#allocation7 + $0x8] ss:$16 sps:$4 sm:$0xff]   ;;  %613 = vset.pattern.permute.xlu0 %v782_v30 }
  0x4f   :  { %591 = vmatpush3.bf16.msra.mxu0 %v590_v5  ;;  %vm154_vm2 = vcmp.lt.s32.totalorder %v153_v10, 4  ;;  %559 = vmatprep.subr.bf16.mxu1 %v781_v1  ;;  %v622_v22 = vld [vmem:[#allocation7 + $0xc] ss:$16 sps:$4 sm:$0xff]   ;;  %v623_v23 = vld [vmem:[#allocation7 + $0x28] ss:$16 sps:$4 sm:$0xff]   ;;  %v784_v49 = vmov 2  }
  0x50   :  { %592 = vmatprep.subr.bf16.mxu0 %v779_v0  ;;  %v624_v24 = vld [vmem:[#allocation7 + $0x2c] ss:$16 sps:$4 sm:$0xff]   ;;  %612 = vset.pattern.permute.xlu1 %v783_v31  ;;  %v785_v52 = vmov 3   ;;  %v172_v60 = vshrl.u32 %v152_v9, 7  ;;  %s786_s3 = smov [#allocation11]  }
  0x51   :  { %s497_s17 = sshll.u32 %s786_s3, 4  ;;  %s498_s17 = int_to_ptr.vmem [resolvable:$true] %s497_s17 }
  0x52   :  { %560 = vmatpush3.bf16.msra.mxu1 %v619_v18  ;;  %vm195_vm6 = vcmp.eq.s32.totalorder %v172_v60, 1  ;;  %vm194_vm7 = vcmp.eq.s32.totalorder %v172_v60, 0  ;;  %s717_s1 = scalar_lea.vmem %s498_s17, 128  ;;  %p722_p5 = scmp.lt.s32.totalorder %s498_s17, %s498_s17 }
  0x53   :  { %594 = vmatpush3.bf16.msra.mxu0 %v593_v7  ;;  %573 = vmatprep.subr.bf16.mxu1 %v781_v1  ;;  %p718_p4 = scmp.ne.s32.totalorder %s498_s17, %s717_s1  ;;  %p723_p6 = scmp.lt.s32.totalorder %s717_s1, %s717_s1 }
  0x54   :  { %565 = vmatprep.subr.bf16.mxu0 %v781_v1 }
  0x55   :  { %562 = vmatmul.mubr.msk.bf16.vlgmr.msra.gmra.mrb[0].mxu1 %vm78_vm1, %v199_v20  ;;  %p724_p7 = por %p723_p6, %p722_p5 }
  0x56   :  { %555 = vmatmul.mubr.msk.f32.vlgmr.msra.gmra.mrb[0].mxu0 %vm78_vm1, %v73_v8  ;;  %574 = vmatpush3.bf16.msra.mxu1 %v621_v21 }
  0x57   :  { %569 = vmatprep.mubr.msk.bf16.mxu0 %vm780_vm0, %v781_v1  ;;  %566 = vmatpush3.bf16.msra.mxu0 %v618_v17  ;;  %p725_p8 = pnand %p724_p7, %p718_p4 }
  0x58   :  { %567 = vmatprep.subr.bf16.mxu0 %v781_v1  ;;  %575 = vmatprep.subr.bf16.mxu1 %v781_v1 }
  0x59   :  { %577 = vmatprep.mubr.msk.bf16.mxu1 %vm780_vm0, %v781_v1 }
  0x5a   :  { %576 = vmatpush3.bf16.msra.mxu1 %v623_v23 }
  0x5b   :  { %568 = vmatpush3.bf16.msra.mxu0 %v620_v19 }
  0x5c   :  { %581 = vmatprep.subr.bf16.mxu0 %v781_v1 }
  0x5d   :  { %578 = vmatmul.mubr.msk.bf16.vlgmr.msra.gmra.mrb[4].mxu1 %vm78_vm1, %v199_v20 }
  0x5e   :  { %570 = vmatmul.mubr.msk.bf16.vlgmr.msra.gmra.mrb[4].mxu0 %vm78_vm1, %v199_v20 }
  0x5f   :  { %582 = vmatpush3.bf16.msra.mxu0 %v622_v22  ;;  %585 = vmatprep.mubr.msk.bf16.mxu0 %vm780_vm0, %v781_v1 }
  0x60   :  { %583 = vmatprep.subr.bf16.mxu0 %v781_v1 }
  0x63   :  { %584 = vmatpush3.bf16.msra.mxu0 %v624_v24 }
  0x66   :  { %586 = vmatmul.mubr.msk.bf16.vlgmr.msra.gmra.mrb[8].mxu0 %vm78_vm1, %v199_v20 }
 0x128   :  { %v890_v32 = vpop.f32.mrb[0].mxu1 }
 0x129   :  { %v148_v11 = vpop.f32.mrb[0].mxu0  ;;  %v563_v34 = vpop.f32.mrb[1].mxu1 }
 0x12a   :  { %v155_v12 = vsel %vm154_vm2, %v148_v11, -inf  ;;  %v556_v13 = vpop.f32.mrb[1].mxu0  ;;  %v263_v36 = vpop.f32.mrb[2].mxu1 }
 0x12b   :  { %156 = vmax.xlane.f32.xlu0 %v155_v12  ;;  %v564_v38 = vpop.f32.mrb[3].mxu1 }
 0x130   :  { %v399_v45 = vpop.f32.mrb[4].mxu1 }
 0x131   :  { %v892_v33 = vpop.f32.mrb[4].mxu0  ;;  %v579_v48 = vpop.f32.mrb[5].mxu1 }
 0x132   :  { %v571_v35 = vpop.f32.mrb[5].mxu0  ;;  %v402_v50 = vpop.f32.mrb[6].mxu1 }
 0x133   :  { %v333_v37 = vpop.f32.mrb[6].mxu0  ;;  %v580_v55 = vpop.f32.mrb[7].mxu1 }
 0x134   :  { %v572_v39 = vpop.f32.mrb[7].mxu0 }
 0x139   :  { %v468_v51 = vpop.f32.mrb[8].mxu0 }
 0x13a   :  { %v587_v56 = vpop.f32.mrb[9].mxu0 }
 0x13b   :  { %v471_v57 = vpop.f32.mrb[10].mxu0 }
 0x13c   :  { %v588_v61 = vpop.f32.mrb[11].mxu0 }
 0x1b8   :  { %v157_v14 = vpop.xlane.xlu0 %156 }
 0x1b9   :  { %vm158_vm3 = vcmp.ge.f32.partialorder %v155_v12, %v157_v14  ;;  %v163_v25 = vsub.f32 %v155_v12, %v157_v14 }
 0x1ba   :  { %v159_v15 = vsel %vm158_vm3, -inf, %v155_v12 }
 0x1bb   :  { %160 = vmax.xlane.f32.xlu0 %v159_v15  ;;  %v164_v26 = vmul.f32 1.442695, %v163_v25 }
 0x1bd   :  { %625 = vpow2.f32 %v164_v26 }
 0x1c7   :  { %v626_v28 = vpop.eup %625 }
 0x248   :  { %v161_v27 = vpop.xlane.xlu0 %160 }
 0x249   :  { %vm162_vm4 = vcmp.ge.f32.partialorder %v155_v12, %v161_v27 }
 0x24a   :  { %v166_v29 = vsel %vm162_vm4, %v626_v28, 0.0 }
 0x24b   :  { %167 = vadd.xlane.f32.xlu1 %v166_v29 }
 0x2d8   :  { %v168_v40 = vpop.xlane.xlu1 %167 }
 0x2d9   :  { %627 = vrcp.f32 %v168_v40 }
 0x2e3   :  { %v628_v41 = vpop.eup %627 }
 0x2e4   :  { %v170_v42 = vmul.f32 %v628_v41, %v166_v29 }
 0x2e6   :  { %337 = vperm.xlu0 %613, %v170_v42   ;;  %268 = vperm.xlu1 %612, %v170_v42   ;;  %v180_v43 = vrot.slane %v170_v42, 4  ;;  %vm186_vm5 = vcmp.gt.f32.partialorder %v170_v42, 0.0 }
 0x2e7   :  { %v187_v44 = vsel %vm186_vm5, 1.0, %v781_v1 }
 0x2e8   :  { %v181_v46 = vadd.f32 %v180_v43, %v170_v42  ;;  %v188_v47 = vrot.slane %v187_v44, 4 }
 0x2ea   :  { %614 = vset.pattern.permute.xlu1 %v784_v49  ;;  %616 = vset.pattern.permute.xlu0 %v785_v52  ;;  %v182_v53 = vrot.slane %v181_v46, 2  ;;  %v189_v54 = vadd.f32 %v188_v47, %v187_v44 }
 0x2eb   :  { %406 = vperm.xlu1 %614, %v170_v42  }
 0x2ec   :  { %v183_v58 = vadd.f32 %v182_v53, %v181_v46  ;;  %v190_v59 = vrot.slane %v189_v54, 2 }
 0x2ee   :  { %v191_v62 = vadd.f32 %v190_v59, %v189_v54  ;;  %v184_v63 = vrot.slane %v183_v58, 1 }
 0x2ef   :  { %615 = vset.pattern.permute.xlu1 %v785_v52 }
 0x2f0   :  { %475 = vperm.xlu1 %615, %v170_v42   ;;  %v192_v0 = vrot.slane %v191_v62, 1  ;;  %v185_v2 = vadd.f32 %v184_v63, %v183_v58 }
 0x2f2   :  { %v193_v1 = vadd.f32 %v192_v0, %v191_v62 }
 0x2f4   :  { %v196_v3 = vsel %vm195_vm6, %v193_v1, 0.0 }
 0x2f5   :  { %v197_v4 = vsel %vm194_vm7, %v185_v2, %v196_v3 }
 0x2f6   :  { %198 = vst [vmem:[#allocation11] sm:$0xff] %v197_v4 }
 0x2f7   :  { %728 = shalt.err (!%p725_p8)
}
 0x2f8   :  { %s729_s20 = scalar_lea.hbm %s927_s5, 128 }
 0x2f9   :  { %p730_p9 = scmp.ne.s32.totalorder %s927_s5, %s729_s20  ;;  %p733_p10 = scmp.lt.u32.totalorder %s729_s20, %s927_s5 }
 0x2fb   :  { %p735_p11 = pnand %p733_p10, %p730_p9 }
 0x2fd   :  { %738 = shalt.err (!%p735_p11)
}
 0x2fe   :  { %500 = dma.vmem_to_hbm [thread:$0]  %s498_s17, 128, %s927_s5, [#allocation12]   ;;  %v513_v5 = vld [vmem:[#allocation8] ss:$0 sm:$0xff]  ;;  %v517_v6 = vld [vmem:[#allocation8 + $0x1] ss:$0 sm:$0xff] }
 0x2ff   :  { %v261_v7 = vadd.f32 %v513_v5, %v890_v32  ;;  %v331_v8 = vadd.f32 %v517_v6, %v892_v33  ;;  %v521_v9 = vld [vmem:[#allocation8 + $0x2] ss:$0 sm:$0xff]  ;;  %v525_v16 = vld [vmem:[#allocation8 + $0x3] ss:$0 sm:$0xff]  ;;  %s787_s5 = smov [#allocation10]  }
 0x300   :  { %v400_v14 = vadd.f32 %v521_v9, %v399_v45  ;;  %v469_v19 = vadd.f32 %v525_v16, %v468_v51  ;;  %s487_s27 = sshll.u32 %s787_s5, 4  ;;  %s488_s27 = int_to_ptr.vmem [resolvable:$true] %s487_s27 }
 0x301   :  { %s739_s0 = scalar_lea.vmem %s488_s27, 128  ;;  %p744_p13 = scmp.lt.s32.totalorder %s488_s27, %s488_s27 }
 0x302   :  { %p740_p12 = scmp.ne.s32.totalorder %s488_s27, %s739_s0  ;;  %p745_p0 = scmp.lt.s32.totalorder %s739_s0, %s739_s0 }
 0x304   :  { %p746_p1 = por %p745_p0, %p744_p13 }
 0x306   :  { %p747_p2 = pnand %p746_p1, %p740_p12 }
 0x365   :  { %v338_v10 = vpop.permute.xlu0 %337  ;;  %v269_v11 = vpop.permute.xlu1 %268 }
 0x366   :  { %v340_v12 = vmul.f32 %v338_v10, %v331_v8  ;;  %v271_v13 = vmul.f32 %v269_v11, %v261_v7 }
 0x368   :  { %v341_v15 = vadd.f32 %v340_v12, %v271_v13 }
 0x36a   :  { %v407_v17 = vpop.permute.xlu1 %406 }
 0x36b   :  { %v409_v18 = vmul.f32 %v407_v17, %v400_v14 }
 0x36d   :  { %v410_v20 = vadd.f32 %v409_v18, %v341_v15 }
 0x36f   :  { %v476_v21 = vpop.permute.xlu1 %475 }
 0x370   :  { %v478_v22 = vmul.f32 %v476_v21, %v469_v19 }
 0x372   :  { %v479_v23 = vadd.f32 %v478_v22, %v410_v20 }
 0x374   :  { %480 = vst [vmem:[#allocation10] sm:$0xff] %v479_v23 }
 0x375   :  { %750 = shalt.err (!%p747_p2)
}
 0x376   :  { %s751_s30 = scalar_lea.hbm %s926_s4, 128 }
 0x377   :  { %p752_p3 = scmp.ne.s32.totalorder %s926_s4, %s751_s30  ;;  %p755_p4 = scmp.lt.u32.totalorder %s751_s30, %s926_s4 }
 0x379   :  { %p757_p5 = pnand %p755_p4, %p752_p3 }
 0x37b   :  { %760 = shalt.err (!%p757_p5)
}
 0x37c   :  { %490 = dma.vmem_to_hbm [thread:$0]  %s488_s27, 128, %s926_s4, [#allocation4]  }
 0x37d   :  { %767 = dma.done.wait [#allocation4], 128  }
 0x37e   :  { %768 = vsyncadd [#allocation4], 4294967168 }
 0x37f   :  { %769 = dma.done.wait [#allocation12], 128  }
 0x380   :  { %770 = vsyncadd [#allocation12], 4294967168 }
 0x381   :  { %507 = vsyncpa [#allocation3], 1 }
 0x382   :  { %508 = vsyncpa [#allocation6], 1 }
 0x383   :  { %509 = vsyncpa [#allocation9], 1 }
 0x384   :  { %510 = vsyncpa [#allocation4], 1 }
 0x385   :  { %511 = vsyncpa [#allocation12], 1 }

</bundles_post_ra>
